<compile_context>
chip_gen: v7x
topology: tpu7x:2x2x1
jax: 0.10.0
libtpu: 0.0.40
codegen_flags: <defaults>
</compile_context>

<pallas_src>
import numpy as np

import jax
import jax.numpy as jnp
from jax.experimental import pallas as pl
from jax.experimental.pallas import tpu as pltpu


def _afm_kernel(emb_ref, mask_ref, w_ref, b1_ref, w2_ref, o_ref):
    # emb_ref  : (TB, F, E)   embeddings tile
    # mask_ref : (1, F*F)     1.0 on strict-upper-triangle pairs, else 0.0
    # w_ref    : (E, A + 1)   [attention-layer-1 weight | projection weight]
    # b1_ref   : (1, A)       attention-layer-1 bias
    # w2_ref   : (1, A)       attention-layer-2 weight (no bias)
    # o_ref    : (TB, 1)      output tile
    TB, F, E = emb_ref.shape
    FF = F * F
    A = w2_ref.shape[1]
    M = TB * FF

    emb = emb_ref[...].astype(jnp.float32)                      # (TB, F, E)

    # Dense all-pairs elementwise products, flattened for the matmul.  The
    # reshapes only merge major dims into the sublane axis (F == 8), so they
    # are layout no-ops.
    p4 = emb[:, :, None, :] * emb[:, None, :, :]                # (TB, F, F, E)
    p2 = p4.reshape(M, E)                                       # (M, E)

    # One MXU matmul produces the attention hidden layer (first A columns)
    # and the per-pair projection value <p, proj_w> (last column).
    w = w_ref[...].astype(jnp.float32)                          # (E, A+1)
    hq = jnp.dot(p2, w, preferred_element_type=jnp.float32)     # (M, A+1)
    hq = hq.reshape(TB, FF, A + 1)                              # (TB, FF, A+1)

    b1 = b1_ref[...].astype(jnp.float32)                        # (1, A)
    w2 = w2_ref[...].astype(jnp.float32)                        # (1, A)

    h = jnp.maximum(hq[:, :, :A] + b1, 0.0)                     # (TB, FF, A)
    scores = jnp.sum(h * w2, axis=-1)                           # (TB, FF)
    q = jnp.sum(hq[:, :, A:A + 1], axis=-1)                     # (TB, FF)

    # Masked softmax over the strict-upper-triangle pairs (lane reductions).
    valid = mask_ref[...] != 0.0                                # (1, FF)
    sm = jnp.where(valid, scores, jnp.float32(-1e30))
    mx = jnp.max(sm, axis=-1, keepdims=True)                    # (TB, 1)
    ex = jnp.where(valid, jnp.exp(sm - mx), 0.0)                # (TB, FF)
    denom = jnp.sum(ex, axis=-1, keepdims=True)                 # (TB, 1)

    # out[b] = sum_p softmax(scores)[b, p] * <p_bp, proj_w>
    num = jnp.sum(ex * q, axis=-1, keepdims=True)               # (TB, 1)
    o_ref[...] = num * pl.reciprocal(denom, approx=True)


def attentional_interaction(embeddings, w1, b1, w2, proj_w, *, tile_b=256):
    """AFM attentional interaction forward (eval mode).

    Args:
      embeddings: (B, F, E) float32
      w1: (A, E) first attention Linear weight (PyTorch layout: out x in)
      b1: (A,)   first attention Linear bias
      w2: (1, A) second attention Linear weight (no bias)
      proj_w: (1, E) projection Linear weight (no bias)
    Returns:
      (B, 1) float32
    """
    B, F, E = embeddings.shape
    A = w1.shape[0]
    FF = F * F

    # Batch tile: clamp to B; keep it a multiple of 8 when tiling is real so
    # the (tile_b, 1) output block satisfies the (8, 128) rule.
    tile_b = max(1, min(tile_b, B))
    if tile_b < B:
        tile_b = ((tile_b + 7) // 8) * 8
    num_tiles = pl.cdiv(B, tile_b)
    B_pad = num_tiles * tile_b
    if B_pad != B:
        embeddings = jnp.pad(embeddings, ((0, B_pad - B), (0, 0), (0, 0)))

    # Strict-upper-triangle pair mask (tiny compile-time constant).
    mask_np = np.zeros((F, F), dtype=np.float32)
    for i in range(F):
        for j in range(i + 1, F):
            mask_np[i, j] = 1.0
    pair_mask = jnp.asarray(mask_np.reshape(1, FF))

    # Kernel-friendly parameter layouts; fold the projection weight into the
    # first attention Linear as one extra output column.
    w_comb = jnp.concatenate(
        [jnp.transpose(w1).astype(jnp.float32),
         jnp.transpose(proj_w).astype(jnp.float32)], axis=1)     # (E, A+1)
    b1_2d = b1.reshape(1, A).astype(jnp.float32)                 # (1, A)
    w2_row = w2.reshape(1, A).astype(jnp.float32)                # (1, A)

    out = pl.pallas_call(
        _afm_kernel,
        out_shape=jax.ShapeDtypeStruct((B_pad, 1), jnp.float32),
        grid=(num_tiles,),
        in_specs=[
            pl.BlockSpec((tile_b, F, E), lambda i: (i, 0, 0)),
            pl.BlockSpec((1, FF), lambda i: (0, 0)),
            pl.BlockSpec((E, A + 1), lambda i: (0, 0)),
            pl.BlockSpec((1, A), lambda i: (0, 0)),
            pl.BlockSpec((1, A), lambda i: (0, 0)),
        ],
        out_specs=pl.BlockSpec((tile_b, 1), lambda i: (i, 0)),
        compiler_params=pltpu.CompilerParams(
            dimension_semantics=("parallel",)),
    )(embeddings, pair_mask, w_comb, b1_2d, w2_row)
    return out[:B]


def _reference(embeddings, w1, b1, w2, proj_w):
    """Pure-JAX reference mirroring the PyTorch module (eval mode)."""
    B, F, E = embeddings.shape
    row, col = [], []
    for i in range(F):
        for j in range(i + 1, F):
            row.append(i)
            col.append(j)
    row = jnp.asarray(row)
    col = jnp.asarray(col)
    p = embeddings[:, row] * embeddings[:, col]          # (B, P, E)
    h = jnp.maximum(p @ w1.T + b1, 0.0)                  # (B, P, A)
    scores = h @ w2.T                                    # (B, P, 1)
    attn = jax.nn.softmax(scores, axis=1)
    s = jnp.sum(p * attn, axis=1)                        # (B, E)
    return s @ proj_w.T                                  # (B, 1)


if __name__ == "__main__":
    B, F, E, A = 2, 8, 32, 16

    key = jax.random.PRNGKey(0)
    k_emb, k_w1, k_b1, k_w2, k_pw = jax.random.split(key, 5)

    embeddings = jax.random.normal(k_emb, (B, F, E), dtype=jnp.float32)

    # Deterministic parameter init (PyTorch-style uniform(-1/sqrt(fan_in), ...)).
    lim1 = 1.0 / (E ** 0.5)
    w1 = jax.random.uniform(k_w1, (A, E), jnp.float32, -lim1, lim1)
    b1 = jax.random.uniform(k_b1, (A,), jnp.float32, -lim1, lim1)
    lim2 = 1.0 / (A ** 0.5)
    w2 = jax.random.uniform(k_w2, (1, A), jnp.float32, -lim2, lim2)
    proj_w = jax.random.uniform(k_pw, (1, E), jnp.float32, -lim1, lim1)

    out = attentional_interaction(embeddings, w1, b1, w2, proj_w)
    out = jax.block_until_ready(out)

    ref = _reference(embeddings, w1, b1, w2, proj_w)
    assert out.shape == (B, 1)
    # Tolerance relaxed vs. exact f32 because of the approx (EUP) reciprocal
    # in the softmax denominator and reordered summations.
    assert jnp.allclose(out, ref, atol=2e-3, rtol=2e-3), (out, ref)

    print("KERNEL_OK")
</pallas_src>

<mosaic_0001>
module attributes {stable_mosaic.version = 11 : i64} {
  func.func @_afm_kernel(%arg0: i32, %arg1: memref<2x8x32xf32, #tpu.memory_space<vmem>>, %arg2: memref<1x64xf32, #tpu.memory_space<vmem>>, %arg3: memref<32x17xf32, #tpu.memory_space<vmem>>, %arg4: memref<1x16xf32, #tpu.memory_space<vmem>>, %arg5: memref<1x16xf32, #tpu.memory_space<vmem>>, %arg6: memref<2x1xf32, #tpu.memory_space<vmem>>) attributes {dimension_semantics = [#tpu.dimension_semantics<parallel>], iteration_bounds = array<i64: 1>, scalar_prefetch = 0 : i64, scratch_operands = 0 : i64, tpu.core_type = #tpu.core_type<tc>, window_params = [{transform_indices = @transform_0, window_bounds = array<i64: 2, 8, 32>}, {pipeline_mode = #tpu.pipeline_mode<synchronous>, transform_indices = @transform_1, window_bounds = array<i64: 1, 64>}, {pipeline_mode = #tpu.pipeline_mode<synchronous>, transform_indices = @transform_2, window_bounds = array<i64: 32, 17>}, {pipeline_mode = #tpu.pipeline_mode<synchronous>, transform_indices = @transform_3, window_bounds = array<i64: 1, 16>}, {pipeline_mode = #tpu.pipeline_mode<synchronous>, transform_indices = @transform_4, window_bounds = array<i64: 1, 16>}, {transform_indices = @transform_5, window_bounds = array<i64: 2, 1>}]} {
    %c0 = arith.constant 0 : index
    %c0_0 = arith.constant 0 : index
    %c0_1 = arith.constant 0 : index
    %0 = vector.load %arg1[%c0, %c0_0, %c0_1] : memref<2x8x32xf32, #tpu.memory_space<vmem>>, vector<2x8x32xf32>
    %1 = vector.shape_cast %0 : vector<2x8x32xf32> to vector<2x8x1x32xf32>
    %2 = vector.shape_cast %0 : vector<2x8x32xf32> to vector<2x1x8x32xf32>
    %3 = vector.broadcast %1 : vector<2x8x1x32xf32> to vector<2x8x8x32xf32>
    %4 = vector.broadcast %2 : vector<2x1x8x32xf32> to vector<2x8x8x32xf32>
    %5 = arith.mulf %3, %4 : vector<2x8x8x32xf32>
    %6 = vector.shape_cast %5 : vector<2x8x8x32xf32> to vector<128x32xf32>
    %c0_2 = arith.constant 0 : index
    %c0_3 = arith.constant 0 : index
    %7 = vector.load %arg3[%c0_2, %c0_3] : memref<32x17xf32, #tpu.memory_space<vmem>>, vector<32x17xf32>
    %cst = arith.constant dense<0.000000e+00> : vector<128x17xf32>
    %8 = tpu.matmul %6, %7, %cst {dimension_numbers = #tpu.dot_dimension_numbers<[1], [0], [0], [1], [0, 0, 1, 1], [], []>} : vector<128x32xf32>, vector<32x17xf32>, vector<128x17xf32> -> vector<128x17xf32>
    %9 = vector.shape_cast %8 : vector<128x17xf32> to vector<2x64x17xf32>
    %c0_4 = arith.constant 0 : index
    %c0_5 = arith.constant 0 : index
    %10 = vector.load %arg4[%c0_4, %c0_5] : memref<1x16xf32, #tpu.memory_space<vmem>>, vector<1x16xf32>
    %c0_6 = arith.constant 0 : index
    %c0_7 = arith.constant 0 : index
    %11 = vector.load %arg5[%c0_6, %c0_7] : memref<1x16xf32, #tpu.memory_space<vmem>>, vector<1x16xf32>
    %12 = vector.extract_strided_slice %9 {offsets = [0, 0, 0], sizes = [2, 64, 16], strides = [1, 1, 1]} : vector<2x64x17xf32> to vector<2x64x16xf32>
    %13 = vector.shape_cast %10 : vector<1x16xf32> to vector<1x1x16xf32>
    %14 = vector.broadcast %13 : vector<1x1x16xf32> to vector<2x64x16xf32>
    %15 = arith.addf %12, %14 : vector<2x64x16xf32>
    %cst_8 = arith.constant 0.000000e+00 : f32
    %16 = vector.broadcast %cst_8 : f32 to vector<2x64x16xf32>
    %17 = arith.maximumf %15, %16 : vector<2x64x16xf32>
    %18 = vector.shape_cast %11 : vector<1x16xf32> to vector<1x1x16xf32>
    %19 = vector.broadcast %18 : vector<1x1x16xf32> to vector<2x64x16xf32>
    %20 = arith.mulf %17, %19 : vector<2x64x16xf32>
    %cst_9 = arith.constant dense<0.000000e+00> : vector<2x64xf32>
    %21 = vector.multi_reduction <add>, %20, %cst_9 [2] : vector<2x64x16xf32> to vector<2x64xf32>
    %22 = vector.extract_strided_slice %9 {offsets = [0, 0, 16], sizes = [2, 64, 1], strides = [1, 1, 1]} : vector<2x64x17xf32> to vector<2x64x1xf32>
    %cst_10 = arith.constant dense<0.000000e+00> : vector<2x64xf32>
    %23 = vector.multi_reduction <add>, %22, %cst_10 [2] : vector<2x64x1xf32> to vector<2x64xf32>
    %c0_11 = arith.constant 0 : index
    %c0_12 = arith.constant 0 : index
    %24 = vector.load %arg2[%c0_11, %c0_12] : memref<1x64xf32, #tpu.memory_space<vmem>>, vector<1x64xf32>
    %cst_13 = arith.constant 0.000000e+00 : f32
    %25 = vector.broadcast %cst_13 : f32 to vector<1x64xf32>
    %26 = arith.cmpf one, %24, %25 : vector<1x64xf32>
    %cst_14 = arith.constant -1.000000e+30 : f32
    %27 = vector.shape_cast %26 : vector<1x64xi1> to vector<1x64xi1>
    %28 = vector.broadcast %27 : vector<1x64xi1> to vector<2x64xi1>
    %29 = vector.broadcast %cst_14 : f32 to vector<2x64xf32>
    %30 = arith.select %28, %21, %29 : vector<2x64xi1>, vector<2x64xf32>
    %cst_15 = arith.constant dense<0xFF800000> : vector<2xf32>
    %31 = vector.multi_reduction <maximumf>, %30, %cst_15 [1] : vector<2x64xf32> to vector<2xf32>
    %32 = vector.shape_cast %31 : vector<2xf32> to vector<2x1xf32>
    %33 = vector.broadcast %32 : vector<2x1xf32> to vector<2x64xf32>
    %34 = arith.subf %30, %33 : vector<2x64xf32>
    %35 = math.exp %34 : vector<2x64xf32>
    %cst_16 = arith.constant 0.000000e+00 : f32
    %36 = vector.shape_cast %26 : vector<1x64xi1> to vector<1x64xi1>
    %37 = vector.broadcast %36 : vector<1x64xi1> to vector<2x64xi1>
    %38 = vector.broadcast %cst_16 : f32 to vector<2x64xf32>
    %39 = arith.select %37, %35, %38 : vector<2x64xi1>, vector<2x64xf32>
    %cst_17 = arith.constant dense<0.000000e+00> : vector<2xf32>
    %40 = vector.multi_reduction <add>, %39, %cst_17 [1] : vector<2x64xf32> to vector<2xf32>
    %41 = vector.shape_cast %40 : vector<2xf32> to vector<2x1xf32>
    %42 = arith.mulf %39, %23 : vector<2x64xf32>
    %cst_18 = arith.constant dense<0.000000e+00> : vector<2xf32>
    %43 = vector.multi_reduction <add>, %42, %cst_18 [1] : vector<2x64xf32> to vector<2xf32>
    %44 = vector.shape_cast %43 : vector<2xf32> to vector<2x1xf32>
    %45 = tpu.reciprocal %41 {approx = true} : vector<2x1xf32> -> vector<2x1xf32>
    %46 = arith.mulf %44, %45 : vector<2x1xf32>
    %c0_19 = arith.constant 0 : index
    %c0_20 = arith.constant 0 : index
    %47 = vector.load %arg6[%c0_19, %c0_20] : memref<2x1xf32, #tpu.memory_space<vmem>>, vector<2x1xf32>
    tpu.vector_store %arg6[%c0_19, %c0_20], %46 {strides = array<i32>} : memref<2x1xf32, #tpu.memory_space<vmem>>, vector<2x1xf32>,
    return
  }
  func.func @transform_0(%arg0: i32) -> (i32, i32, i32) {
    %c0_i32 = arith.constant 0 : i32
    %c0_i32_0 = arith.constant 0 : i32
    %c0_i32_1 = arith.constant 0 : i32
    return %arg0, %c0_i32, %c0_i32_0 : i32, i32, i32
  }
  func.func @transform_1(%arg0: i32) -> (i32, i32) {
    %c0_i32 = arith.constant 0 : i32
    %c0_i32_0 = arith.constant 0 : i32
    %c0_i32_1 = arith.constant 0 : i32
    return %c0_i32, %c0_i32_0 : i32, i32
  }
  func.func @transform_2(%arg0: i32) -> (i32, i32) {
    %c0_i32 = arith.constant 0 : i32
    %c0_i32_0 = arith.constant 0 : i32
    %c0_i32_1 = arith.constant 0 : i32
    return %c0_i32, %c0_i32_0 : i32, i32
  }
  func.func @transform_3(%arg0: i32) -> (i32, i32) {
    %c0_i32 = arith.constant 0 : i32
    %c0_i32_0 = arith.constant 0 : i32
    %c0_i32_1 = arith.constant 0 : i32
    return %c0_i32, %c0_i32_0 : i32, i32
  }
  func.func @transform_4(%arg0: i32) -> (i32, i32) {
    %c0_i32 = arith.constant 0 : i32
    %c0_i32_0 = arith.constant 0 : i32
    %c0_i32_1 = arith.constant 0 : i32
    return %c0_i32, %c0_i32_0 : i32, i32
  }
  func.func @transform_5(%arg0: i32) -> (i32, i32) {
    %c0_i32 = arith.constant 0 : i32
    %c0_i32_0 = arith.constant 0 : i32
    return %arg0, %c0_i32 : i32, i32
  }
}

</mosaic_0001>

<bundles_post_ra>
// kernel: tpu_custom_call.1
= control target key start
LH: loop header
LB: loop body
LE: loop exit
PB: predicated region body
PF: predicated region fallthrough
CT: control target
= control target key end

     0   :  { %v28_v0 = vlaneseq  ;;  %v925_v4 = vmov 1966171168   ;;  %vm222_vm0 = vcmask 261120   ;;  %vm478_vm1 = vcmask 130048   ;;  %s1260_s2 = inlined_call_operand.vmem [shape: f32[32,17], index: 2, kind: input, shape index: {}]   ;;  %s1261_s0 = inlined_call_operand.vmem [shape: f32[2,8,32], index: 0, kind: input, shape index: {}]   ;;  %s1262_s3 = inlined_call_operand.vmem [shape: f32[1,16], index: 3, kind: input, shape index: {}]   ;;  %s1263_s4 = inlined_call_operand.vmem [shape: f32[1,16], index: 4, kind: input, shape index: {}]   ;;  %s1264_s1 = inlined_call_operand.vmem [shape: f32[1,64], index: 1, kind: input, shape index: {}]   ;;  %s1265_s5 = inlined_call_operand.vmem [shape: f32[2,1], index: 5, kind: output, shape index: {}]  }
   0x1   :  { %v218_v1 = vld [vmem:[%s1260_s2] sm:$0xff]  ;;  %v219_v2 = vld [vmem:[%s1260_s2 + $0x8] sm:$0xff]  ;;  %v220_v3 = vld [vmem:[%s1260_s2 + $0x10] sm:$0xff]  ;;  %v26_v5 = vunpack.c.l.s4 %v925_v4  ;;  %vm578_vm2 = vcmask 130112   ;;  %vm585_vm4 = vcmask 195712   ;;  %vm592_vm5 = vcmask 261312  }
   0x2   :  { %v902_v6 = vpack.c.bf16 %v219_v2, %v218_v1  ;;  %v221_v7 = vld [vmem:[%s1260_s2 + $0x18] sm:$0xff]  ;;  %v973_v8 = vld [vmem:[%s1261_s0] sm:$0xff]  ;;  %v976_v9 = vshrl.u32 %v28_v0, 7  ;;  %v981_v10 = vld [vmem:[%s1261_s0 + $0x8] sm:$0xff]  ;;  %vm599_vm6 = vcmask 326912   ;;  %vm606_vm7 = vcmask 392512  }
   0x3   :  { %v906_v11 = vpack.c.bf16 %v221_v7, %v220_v3  ;;  %v27_v12 = vunpack.c.0.s8 %v26_v5  ;;  %v24_v13 = vcombine.high %v973_v8, %v973_v8  ;;  %v73_v14 = vcombine.high %v981_v10, %v981_v10 }
   0x4   :  { %903 = vmatprep.subr.bf16.mxu0 %v902_v6  ;;  %910 = vmatprep.subr.bf16.mxu1 %v902_v6  ;;  %v989_v16 = vsub.s32 0, %v976_v9  ;;  %vm613_vm8 = vcmask 458112   ;;  %vm620_vm9 = vcmask 523712   ;;  %vm661_vm10 = vcmask 1041409  }
   0x5   :  { %905 = vmatpush3.bf16.msra.mxu0 %v902_v6  ;;  %912 = vmatpush3.bf16.msra.mxu1 %v902_v6  ;;  %v30_v15 = vsub.s32 %v27_v12, %v976_v9  ;;  %vm665_vm12 = vcmask 517120   ;;  %vm826_vm13 = vcmask 1024  }
   0x6   :  { %907 = vmatprep.subr.bf16.mxu0 %v906_v11  ;;  %911 = vmatprep.subr.bf16.mxu1 %v906_v11 }
   0x7   :  { %v31_v17 = vrot.slane %v973_v8, %v30_v15  ;;  %v80_v18 = vrot.slane %v981_v10, %v30_v15  ;;  %v38_v19 = vrot.slane %v24_v13, %v30_v15  ;;  %v87_v20 = vrot.slane %v73_v14, %v30_v15  ;;  %v1044_v14 = vld [vmem:[%s1262_s3] ss:$0 sm:$0xff] }
   0x8   :  { %v926_v13 = vmov 16  }
   0x9   :  { %909 = vmatpush3.bf16.msra.mxu0 %v906_v11  ;;  %913 = vmatpush3.bf16.msra.mxu1 %v906_v11  ;;  %v39_v21 = vcombine.high %v31_v17, %v31_v17  ;;  %v47_v22 = vrot.slane %v31_v17, %v30_v15  ;;  %v88_v23 = vcombine.high %v80_v18, %v80_v18 }
   0xa   :  { %v96_v24 = vrot.slane %v80_v18, %v30_v15  ;;  %v54_v25 = vrot.slane %v38_v19, %v30_v15  ;;  %v103_v26 = vrot.slane %v87_v20, %v30_v15  ;;  %v40_v27 = vcombine.high %v38_v19, %v38_v19  ;;  %917 = vset.pattern.permute.xlu1 %v926_v13 }
   0xb   :  { %v69_v28 = vcombine.high %v47_v22, %v47_v22  ;;  %v125_v29 = vrot.slane %v47_v22, %v989_v16  ;;  %v61_v30 = vrot.slane %v39_v21, %v30_v15  ;;  %v110_v31 = vrot.slane %v88_v23, %v30_v15  ;;  %918 = vset.pattern.permute.xlu0 %v926_v13  ;;  %v1065_v22 = vld [vmem:[%s1263_s4] ss:$0 sm:$0xff] }
   0xc   :  { %v118_v32 = vcombine.high %v96_v24, %v96_v24  ;;  %v157_v33 = vrot.slane %v96_v24, %v989_v16  ;;  %v141_v34 = vrot.slane %v54_v25, %v989_v16  ;;  %v173_v35 = vrot.slane %v103_v26, %v989_v16 }
   0xd   :  { %v202_v36 = vmul.f32 %v125_v29, %v973_v8  ;;  %v129_v37 = vrot.slane %v61_v30, %v989_v16  ;;  %v161_v38 = vrot.slane %v110_v31, %v989_v16  ;;  %v133_v39 = vrot.slane %v69_v28, %v989_v16 }
   0xe   :  { %v210_v40 = vmul.f32 %v157_v33, %v981_v10  ;;  %v165_v41 = vrot.slane %v118_v32, %v989_v16  ;;  %v71_v42 = vcombine.high %v61_v30, %v61_v30  ;;  %v120_v43 = vcombine.high %v110_v31, %v110_v31 }
   0xf   :  { %878 = vmatprep.mubr.msk.f32.mxu0 %vm222_vm0, %v202_v36  ;;  %v203_v44 = vmul.f32 %v129_v37, %v973_v8  ;;  %v211_v45 = vmul.f32 %v161_v38, %v981_v10  ;;  %v204_v46 = vmul.f32 %v133_v39, %v973_v8  ;;  %v206_v47 = vmul.f32 %v141_v34, %v973_v8 }
  0x10   :  { %890 = vmatprep.mubr.msk.f32.mxu1 %vm222_vm0, %v210_v40  ;;  %v212_v48 = vmul.f32 %v165_v41, %v981_v10  ;;  %v137_v49 = vrot.slane %v71_v42, %v989_v16  ;;  %v169_v50 = vrot.slane %v120_v43, %v989_v16  ;;  %v214_v51 = vmul.f32 %v173_v35, %v981_v10 }
  0x11   :  { %879 = vmatmul.mubr.msk.f32.vlgmr.msra.gmra.mrb[0].mxu0 %vm222_vm0, %v203_v44  ;;  %891 = vmatmul.mubr.msk.f32.vlgmr.msra.gmra.mrb[0].mxu1 %vm222_vm0, %v211_v45  ;;  %v68_v52 = vrot.slane %v40_v27, %v30_v15  ;;  %v89_v53 = vcombine.high %v87_v20, %v87_v20  ;;  %v70_v54 = vcombine.high %v54_v25, %v54_v25 }
  0x12   :  { %881 = vmatprep.mubr.msk.f32.mxu0 %vm222_vm0, %v204_v46  ;;  %893 = vmatprep.mubr.msk.f32.mxu1 %vm222_vm0, %v212_v48  ;;  %v205_v55 = vmul.f32 %v137_v49, %v973_v8  ;;  %v213_v56 = vmul.f32 %v169_v50, %v981_v10  ;;  %v119_v57 = vcombine.high %v103_v26, %v103_v26 }
  0x13   :  { %v145_v58 = vrot.slane %v68_v52, %v989_v16  ;;  %v117_v59 = vrot.slane %v89_v53, %v30_v15  ;;  %v149_v60 = vrot.slane %v70_v54, %v989_v16  ;;  %v72_v61 = vcombine.high %v68_v52, %v68_v52 }
  0x14   :  { %v181_v62 = vrot.slane %v119_v57, %v989_v16 }
  0x15   :  { %882 = vmatmul.mubr.msk.f32.gmra.mrb[2].mxu0 %vm222_vm0, %v205_v55  ;;  %894 = vmatmul.mubr.msk.f32.gmra.mrb[2].mxu1 %vm222_vm0, %v213_v56  ;;  %v207_v63 = vmul.f32 %v145_v58, %v973_v8  ;;  %v177_v1 = vrot.slane %v117_v59, %v989_v16  ;;  %v208_v2 = vmul.f32 %v149_v60, %v973_v8 }
  0x16   :  { %884 = vmatprep.mubr.msk.f32.mxu0 %vm222_vm0, %v206_v47  ;;  %896 = vmatprep.mubr.msk.f32.mxu1 %vm222_vm0, %v214_v51  ;;  %v216_v3 = vmul.f32 %v181_v62, %v981_v10  ;;  %v153_v4 = vrot.slane %v72_v61, %v989_v16  ;;  %v121_v5 = vcombine.high %v117_v59, %v117_v59 }
  0x17   :  { %v215_v6 = vmul.f32 %v177_v1, %v981_v10 }
  0x18   :  { %v185_v7 = vrot.slane %v121_v5, %v989_v16  ;;  %v209_v11 = vmul.f32 %v153_v4, %v973_v8 }
  0x19   :  { %885 = vmatmul.mubr.msk.f32.gmra.mrb[4].mxu0 %vm222_vm0, %v207_v63  ;;  %897 = vmatmul.mubr.msk.f32.gmra.mrb[4].mxu1 %vm222_vm0, %v215_v6 }
  0x1a   :  { %887 = vmatprep.mubr.msk.f32.mxu0 %vm222_vm0, %v208_v2  ;;  %899 = vmatprep.mubr.msk.f32.mxu1 %vm222_vm0, %v216_v3  ;;  %v217_v12 = vmul.f32 %v185_v7, %v981_v10 }
  0x1d   :  { %888 = vmatmul.mubr.msk.f32.gmra.mrb[6].mxu0 %vm222_vm0, %v209_v11  ;;  %900 = vmatmul.mubr.msk.f32.gmra.mrb[6].mxu1 %vm222_vm0, %v217_v12 }
  0xe4   :  { %v1046_v15 = vpop.f32.mrb[0].mxu0  ;;  %v1048_v8 = vpop.f32.mrb[0].mxu1 }
  0xe5   :  { %v425_v17 = vadd.f32 %v1046_v15, %v1044_v14  ;;  %v433_v10 = vadd.f32 %v1048_v8, %v1044_v14  ;;  %v1054_v18 = vpop.f32.mrb[1].mxu0  ;;  %v1056_v19 = vpop.f32.mrb[1].mxu1 }
  0xe6   :  { %v424_v20 = vadd.f32 %v1044_v14, %v1054_v18  ;;  %v432_v21 = vadd.f32 %v1044_v14, %v1056_v19 }
  0xe7   :  { %v441_v23 = vmax.f32 %v425_v17, 0.0  ;;  %v449_v24 = vmax.f32 %v433_v10, 0.0 }
  0xe8   :  { %v440_v25 = vmax.f32 %v424_v20, 0.0  ;;  %v448_v26 = vmax.f32 %v432_v21, 0.0  ;;  %v1067_v27 = vpop.f32.mrb[2].mxu0  ;;  %v1069_v28 = vpop.f32.mrb[2].mxu1 }
  0xe9   :  { %v427_v29 = vadd.f32 %v1067_v27, %v1044_v14  ;;  %v435_v30 = vadd.f32 %v1069_v28, %v1044_v14  ;;  %v471_v31 = vmul.f32 %v1065_v22, %v449_v24  ;;  %v1076_v32 = vpop.f32.mrb[3].mxu1  ;;  %v463_v33 = vmul.f32 %v1065_v22, %v441_v23  ;;  %v1079_v34 = vpop.f32.mrb[3].mxu0 }
  0xea   :  { %v434_v35 = vadd.f32 %v1044_v14, %v1076_v32  ;;  %v426_v36 = vadd.f32 %v1044_v14, %v1079_v34  ;;  %v470_v37 = vmul.f32 %v1065_v22, %v448_v26  ;;  %v462_v38 = vmul.f32 %v1065_v22, %v440_v25 }
  0xeb   :  { %v443_v39 = vmax.f32 %v427_v29, 0.0  ;;  %v451_v40 = vmax.f32 %v435_v30, 0.0  ;;  %v506_v41 = vsel %vm478_vm1, %v471_v31, 0.0  ;;  %v482_v42 = vsel %vm478_vm1, %v463_v33, 0.0 }
  0xec   :  { %507 = vadd.xlane.f32.xlu1 %v506_v41  ;;  %483 = vadd.xlane.f32.xlu0 %v482_v42  ;;  %v1089_v43 = vpop.f32.mrb[4].mxu0  ;;  %v1091_v44 = vpop.f32.mrb[4].mxu1  ;;  %v450_v51 = vmax.f32 %v434_v35, 0.0  ;;  %v442_v52 = vmax.f32 %v426_v36, 0.0  ;;  %v503_v53 = vsel %vm478_vm1, %v470_v37, 0.0  ;;  %v479_v54 = vsel %vm478_vm1, %v462_v38, 0.0 }
  0xed   :  { %v429_v45 = vadd.f32 %v1089_v43, %v1044_v14  ;;  %v437_v46 = vadd.f32 %v1091_v44, %v1044_v14  ;;  %v473_v47 = vmul.f32 %v1065_v22, %v451_v40  ;;  %v1098_v48 = vpop.f32.mrb[5].mxu1  ;;  %v465_v49 = vmul.f32 %v1065_v22, %v443_v39  ;;  %v1101_v50 = vpop.f32.mrb[5].mxu0 }
  0xee   :  { %v436_v63 = vadd.f32 %v1044_v14, %v1098_v48  ;;  %v428_v1 = vadd.f32 %v1044_v14, %v1101_v50  ;;  %v472_v2 = vmul.f32 %v1065_v22, %v450_v51  ;;  %v464_v3 = vmul.f32 %v1065_v22, %v442_v52 }
  0xef   :  { %v445_v57 = vmax.f32 %v429_v45, 0.0  ;;  %v453_v58 = vmax.f32 %v437_v46, 0.0  ;;  %v512_v59 = vsel %vm478_vm1, %v473_v47, 0.0  ;;  %v488_v60 = vsel %vm478_vm1, %v465_v49, 0.0 }
  0xf0   :  { %504 = vadd.xlane.f32.xlu1 %v503_v53  ;;  %480 = vadd.xlane.f32.xlu0 %v479_v54  ;;  %v1105_v55 = vpop.f32.mrb[6].mxu0  ;;  %v1107_v56 = vpop.f32.mrb[6].mxu1  ;;  %v452_v11 = vmax.f32 %v436_v63, 0.0  ;;  %v444_v12 = vmax.f32 %v428_v1, 0.0  ;;  %v509_v13 = vsel %vm478_vm1, %v472_v2, 0.0  ;;  %v485_v17 = vsel %vm478_vm1, %v464_v3, 0.0 }
  0xf1   :  { %v367_v61 = vpop.f32.mrb[7].mxu0  ;;  %v407_v62 = vpop.f32.mrb[7].mxu1  ;;  %v475_v6 = vmul.f32 %v1065_v22, %v453_v58  ;;  %v467_v7 = vmul.f32 %v1065_v22, %v445_v57  ;;  %v431_v24 = vadd.f32 %v1105_v55, %v1044_v14  ;;  %v439_v25 = vadd.f32 %v1107_v56, %v1044_v14 }
  0xf2   :  { %v430_v4 = vadd.f32 %v1044_v14, %v367_v61  ;;  %v438_v5 = vadd.f32 %v1044_v14, %v407_v62  ;;  %v474_v26 = vmul.f32 %v1065_v22, %v452_v11  ;;  %v466_v29 = vmul.f32 %v1065_v22, %v444_v12 }
  0xf3   :  { %v518_v21 = vsel %vm478_vm1, %v475_v6, 0.0  ;;  %v494_v23 = vsel %vm478_vm1, %v467_v7, 0.0  ;;  %v447_v33 = vmax.f32 %v431_v24, 0.0  ;;  %v455_v35 = vmax.f32 %v439_v25, 0.0 }
  0xf4   :  { %513 = vadd.xlane.f32.xlu1 %v512_v59  ;;  %489 = vadd.xlane.f32.xlu0 %v488_v60  ;;  %v446_v10 = vmax.f32 %v430_v4, 0.0  ;;  %v454_v20 = vmax.f32 %v438_v5, 0.0  ;;  %v515_v36 = vsel %vm478_vm1, %v474_v26, 0.0  ;;  %v491_v37 = vsel %vm478_vm1, %v466_v29, 0.0 }
  0xf5   :  { %v477_v39 = vmul.f32 %v1065_v22, %v455_v35  ;;  %v469_v40 = vmul.f32 %v1065_v22, %v447_v33  ;;  %v927_v6 = vmov 0  }
  0xf6   :  { %v476_v30 = vmul.f32 %v1065_v22, %v454_v20  ;;  %v468_v31 = vmul.f32 %v1065_v22, %v446_v10  ;;  %v568_v22 = vand.u32 127, %v28_v0  ;;  %v543_v0 = vld [vmem:[%s1264_s1] sm:$0x1] }
  0xf7   :  { %v524_v41 = vsel %vm478_vm1, %v477_v39, 0.0  ;;  %v500_v42 = vsel %vm478_vm1, %v469_v40, 0.0  ;;  %vm544_vm3 = vcmp.ne.f32.partialorder %v543_v0, 0.0 }
  0xf8   :  { %510 = vadd.xlane.f32.xlu1 %v509_v13  ;;  %486 = vadd.xlane.f32.xlu0 %v485_v17  ;;  %v521_v14 = vsel %vm478_vm1, %v476_v30, 0.0  ;;  %v497_v38 = vsel %vm478_vm1, %v468_v31, 0.0  ;;  %v1156_v46 = vsub.s32 %v568_v22, %v976_v9  ;;  %v587_v47 = vadd.s32 4294967272, %v568_v22 }
  0xf9   :  { %v608_v52 = vadd.s32 4294967248, %v568_v22  ;;  %v615_v5 = vadd.s32 4294967240, %v568_v22  ;;  %v545_v7 = vsel %vm544_vm3, 1, %v927_v6 }
  0xfa   :  { %v549_v30 = vrot.slane %v545_v7, %v989_v16 }
  0xfb   :  { %v1180_v2 = vsub.s32 %v608_v52, %v976_v9  ;;  %v1196_v29 = vsub.s32 %v615_v5, %v976_v9 }
  0xfc   :  { %519 = vadd.xlane.f32.xlu1 %v518_v21  ;;  %495 = vadd.xlane.f32.xlu0 %v494_v23  ;;  %vm1211_vm11 = vcmp.eq.s32.totalorder %v549_v30, 1 }
 0x100   :  { %516 = vadd.xlane.f32.xlu1 %v515_v36  ;;  %492 = vadd.xlane.f32.xlu0 %v491_v37 }
 0x104   :  { %522 = vadd.xlane.f32.xlu1 %v521_v14  ;;  %498 = vadd.xlane.f32.xlu0 %v497_v38 }
 0x108   :  { %525 = vadd.xlane.f32.xlu1 %v524_v41  ;;  %501 = vadd.xlane.f32.xlu0 %v500_v42 }
 0x119   :  { %693 = vperm.xlu1 %917, %v1054_v18  }
 0x11d   :  { %717 = vperm.xlu1 %917, %v1056_v19  }
 0x11e   :  { %696 = vperm.xlu0 %918, %v1046_v15  }
 0x121   :  { %720 = vperm.xlu1 %917, %v1048_v8  }
 0x122   :  { %708 = vperm.xlu0 %918, %v1089_v43   ;;  %v573_v43 = vadd.s32 4294967288, %v568_v22 }
 0x124   :  { %v1162_v49 = vsub.s32 %v573_v43, %v976_v9 }
 0x125   :  { %699 = vperm.xlu1 %917, %v1079_v34  }
 0x126   :  { %711 = vperm.xlu0 %918, %v367_v61  }
 0x129   :  { %723 = vperm.xlu1 %917, %v1076_v32  }
 0x12d   :  { %702 = vperm.xlu1 %917, %v1067_v27   ;;  %v580_v27 = vadd.s32 4294967280, %v568_v22 }
 0x131   :  { %726 = vperm.xlu1 %917, %v1069_v28  }
 0x135   :  { %705 = vperm.xlu1 %917, %v1101_v50  }
 0x139   :  { %729 = vperm.xlu1 %917, %v1098_v48   ;;  %v1159_v48 = vsub.s32 %v580_v27, %v976_v9 }
 0x13d   :  { %732 = vperm.xlu1 %917, %v1091_v44   ;;  %v594_v44 = vadd.s32 4294967264, %v568_v22 }
 0x13f   :  { %v1173_v57 = vsub.s32 %v594_v44, %v976_v9 }
 0x141   :  { %735 = vperm.xlu1 %917, %v407_v62   ;;  %v601_v62 = vadd.s32 4294967256, %v568_v22 }
 0x143   :  { %v1191_v21 = vsub.s32 %v601_v62, %v976_v9 }
 0x145   :  { %738 = vperm.xlu1 %917, %v1107_v56   ;;  %v1170_v56 = vsub.s32 %v587_v47, %v976_v9 }
 0x179   :  { %v508_v15 = vpop.xlane.xlu1 %507  ;;  %v484_v8 = vpop.xlane.xlu0 %483 }
 0x17a   :  { %v629_v60 = vrot.slane %v508_v15, %v1162_v49  ;;  %v577_v61 = vrot.slane %v484_v8, %v1162_v49 }
 0x17d   :  { %v505_v18 = vpop.xlane.xlu1 %504  ;;  %v481_v19 = vpop.xlane.xlu0 %480 }
 0x17e   :  { %v625_v53 = vrot.slane %v505_v18, %v1156_v46  ;;  %v572_v54 = vrot.slane %v481_v19, %v1156_v46 }
 0x180   :  { %v630_v3 = vsel %vm578_vm2, %v629_v60, %v625_v53  ;;  %v579_v4 = vsel %vm578_vm2, %v577_v61, %v572_v54 }
 0x181   :  { %v514_v32 = vpop.xlane.xlu1 %513  ;;  %v490_v34 = vpop.xlane.xlu0 %489 }
 0x182   :  { %v639_v10 = vrot.slane %v514_v32, %v1170_v56  ;;  %v591_v20 = vrot.slane %v490_v34, %v1170_v56 }
 0x185   :  { %v511_v28 = vpop.xlane.xlu1 %510  ;;  %v487_v45 = vpop.xlane.xlu0 %486 }
 0x186   :  { %v634_v58 = vrot.slane %v511_v28, %v1159_v48  ;;  %v584_v59 = vrot.slane %v487_v45, %v1159_v48 }
 0x188   :  { %v635_v11 = vsel %vm585_vm4, %v634_v58, %v630_v3  ;;  %v586_v12 = vsel %vm585_vm4, %v584_v59, %v579_v4 }
 0x189   :  { %v520_v50 = vpop.xlane.xlu1 %519  ;;  %v496_v51 = vpop.xlane.xlu0 %495  ;;  %v640_v25 = vsel %vm592_vm5, %v639_v10, %v635_v11  ;;  %v593_v26 = vsel %vm592_vm5, %v591_v20, %v586_v12 }
 0x18a   :  { %v649_v37 = vrot.slane %v520_v50, %v1191_v21  ;;  %v605_v14 = vrot.slane %v496_v51, %v1191_v21 }
 0x18d   :  { %v517_v63 = vpop.xlane.xlu1 %516  ;;  %v493_v1 = vpop.xlane.xlu0 %492 }
 0x18e   :  { %v644_v13 = vrot.slane %v517_v63, %v1173_v57  ;;  %v598_v17 = vrot.slane %v493_v1, %v1173_v57 }
 0x190   :  { %v645_v31 = vsel %vm599_vm6, %v644_v13, %v640_v25  ;;  %v600_v33 = vsel %vm599_vm6, %v598_v17, %v593_v26 }
 0x191   :  { %v523_v23 = vpop.xlane.xlu1 %522  ;;  %v499_v24 = vpop.xlane.xlu0 %498  ;;  %v650_v9 = vsel %vm606_vm7, %v649_v37, %v645_v31  ;;  %v607_v16 = vsel %vm606_vm7, %v605_v14, %v600_v33 }
 0x192   :  { %v654_v35 = vrot.slane %v523_v23, %v1180_v2  ;;  %v612_v36 = vrot.slane %v499_v24, %v1180_v2 }
 0x194   :  { %v655_v42 = vsel %vm613_vm8, %v654_v35, %v650_v9  ;;  %v614_v15 = vsel %vm613_vm8, %v612_v36, %v607_v16 }
 0x195   :  { %v526_v38 = vpop.xlane.xlu1 %525  ;;  %v502_v39 = vpop.xlane.xlu0 %501 }
 0x196   :  { %v659_v40 = vrot.slane %v526_v38, %v1196_v29  ;;  %v619_v41 = vrot.slane %v502_v39, %v1196_v29 }
 0x198   :  { %v621_v18 = vsel %vm620_vm9, %v619_v41, %v614_v15  ;;  %v660_v19 = vsel %vm620_vm9, %v659_v40, %v655_v42 }
 0x199   :  { %v694_v22 = vpop.permute.xlu1 %693  ;;  %v662_v32 = vsel %vm661_vm10, %v660_v19, %v621_v18 }
 0x19a   :  { %v664_v34 = vsel %vm1211_vm11, %v662_v32, -1e+30  ;;  %v743_v45 = vrot.slane %v694_v22, %v1156_v46 }
 0x19b   :  { %v666_v27 = vsel %vm665_vm12, %v664_v34, -inf }
 0x19c   :  { %667 = vmax.xlane.f32.xlu0 %v666_v27 }
 0x19d   :  { %v718_v43 = vpop.permute.xlu1 %717  ;;  %v697_v28 = vpop.permute.xlu0 %696 }
 0x19e   :  { %v747_v47 = vrot.slane %v697_v28, %v1162_v49  ;;  %v782_v50 = vrot.slane %v718_v43, %v1156_v46 }
 0x1a0   :  { %v748_v44 = vsel %vm578_vm2, %v747_v47, %v743_v45 }
 0x1a1   :  { %v721_v0 = vpop.permute.xlu1 %720  ;;  %v709_v1 = vpop.permute.xlu0 %708 }
 0x1a2   :  { %v786_v51 = vrot.slane %v721_v0, %v1162_v49 }
 0x1a4   :  { %v787_v52 = vsel %vm578_vm2, %v786_v51, %v782_v50 }
 0x1a5   :  { %v700_v53 = vpop.permute.xlu1 %699  ;;  %v712_v5 = vpop.permute.xlu0 %711 }
 0x1a6   :  { %v752_v54 = vrot.slane %v700_v53, %v1159_v48  ;;  %v772_v11 = vrot.slane %v712_v5, %v1180_v2 }
 0x1a8   :  { %v753_v58 = vsel %vm585_vm4, %v752_v54, %v748_v44 }
 0x1a9   :  { %v724_v59 = vpop.permute.xlu1 %723 }
 0x1aa   :  { %v791_v60 = vrot.slane %v724_v59, %v1159_v48  ;;  %v767_v48 = vrot.slane %v709_v1, %v1191_v21 }
 0x1ac   :  { %v792_v61 = vsel %vm585_vm4, %v791_v60, %v787_v52 }
 0x1ad   :  { %v703_v62 = vpop.permute.xlu1 %702 }
 0x1ae   :  { %v757_v63 = vrot.slane %v703_v62, %v1170_v56 }
 0x1b0   :  { %v758_v46 = vsel %vm592_vm5, %v757_v63, %v753_v58 }
 0x1b1   :  { %v727_v3 = vpop.permute.xlu1 %726 }
 0x1b2   :  { %v796_v49 = vrot.slane %v727_v3, %v1170_v56  ;;  %714 = vperm.xlu0 %918, %v1105_v55  }
 0x1b4   :  { %v797_v4 = vsel %vm592_vm5, %v796_v49, %v792_v61 }
 0x1b5   :  { %v706_v6 = vpop.permute.xlu1 %705 }
 0x1b6   :  { %v762_v7 = vrot.slane %v706_v6, %v1173_v57 }
 0x1b8   :  { %v763_v12 = vsel %vm599_vm6, %v762_v7, %v758_v46 }
 0x1b9   :  { %v768_v13 = vsel %vm606_vm7, %v767_v48, %v763_v12  ;;  %v730_v17 = vpop.permute.xlu1 %729 }
 0x1ba   :  { %v801_v10 = vrot.slane %v730_v17, %v1173_v57  ;;  %v773_v56 = vsel %vm613_vm8, %v772_v11, %v768_v13 }
 0x1bc   :  { %v802_v55 = vsel %vm599_vm6, %v801_v10, %v797_v4 }
 0x1bd   :  { %v733_v20 = vpop.permute.xlu1 %732 }
 0x1be   :  { %v806_v23 = vrot.slane %v733_v20, %v1191_v21 }
 0x1c0   :  { %v807_v24 = vsel %vm606_vm7, %v806_v23, %v802_v55 }
 0x1c1   :  { %v736_v25 = vpop.permute.xlu1 %735 }
 0x1c2   :  { %v811_v26 = vrot.slane %v736_v25, %v1180_v2 }
 0x1c4   :  { %v812_v30 = vsel %vm613_vm8, %v811_v26, %v807_v24 }
 0x1c5   :  { %v739_v36 = vpop.permute.xlu1 %738 }
 0x1c6   :  { %v816_v57 = vrot.slane %v739_v36, %v1196_v29 }
 0x1c8   :  { %v817_v38 = vsel %vm620_vm9, %v816_v57, %v812_v30 }
 0x229   :  { %v668_v31 = vpop.xlane.xlu0 %667 }
 0x22a   :  { %v669_v33 = vsub.f32 %v664_v34, %v668_v31 }
 0x22c   :  { %v670_v35 = vmul.f32 1.442695, %v669_v33 }
 0x22e   :  { %921 = vpow2.f32 %v670_v35 }
 0x231   :  { %v715_v37 = vpop.permute.xlu0 %714 }
 0x232   :  { %v777_v14 = vrot.slane %v715_v37, %v1196_v29 }
 0x234   :  { %v778_v21 = vsel %vm620_vm9, %v777_v14, %v773_v56 }
 0x235   :  { %v818_v39 = vsel %vm661_vm10, %v817_v38, %v778_v21 }
 0x238   :  { %v922_v9 = vpop.eup %921 }
 0x239   :  { %v672_v2 = vsel %vm1211_vm11, %v922_v9, 0.0 }
 0x23a   :  { %v673_v16 = vsel %vm665_vm12, %v672_v2, 0.0  ;;  %v820_v40 = vmul.f32 %v818_v39, %v672_v2 }
 0x23b   :  { %674 = vadd.xlane.f32.xlu0 %v673_v16 }
 0x23c   :  { %v821_v41 = vsel %vm665_vm12, %v820_v40, 0.0 }
 0x23d   :  { %822 = vadd.xlane.f32.xlu1 %v821_v41 }
 0x2c8   :  { %v675_v42 = vpop.xlane.xlu0 %674 }
 0x2c9   :  { %923 = vrcp.f32 %v675_v42 }
 0x2ca   :  { %v823_v15 = vpop.xlane.xlu1 %822 }
 0x2d3   :  { %v924_v29 = vpop.eup %923 }
 0x2d4   :  { %v825_v18 = vmul.f32 %v924_v29, %v823_v15 }
 0x2d6   :  { %827 = vst.msk [vmem:[%s1265_s5] sm:$0x3] %vm826_vm13, %v825_v18 }

</bundles_post_ra>
